<compile_context>
chip_gen: v7x
topology: tpu7x:2x2x1
jax: 0.10.0
libtpu: 0.0.40
codegen_flags: <defaults>
</compile_context>

<pallas_src>
import jax
import jax.numpy as jnp
from jax.experimental import pallas as pl
from jax.experimental.pallas import tpu as pltpu

LANE = 128        # hidden dim padded to a multiple of the lane width
SUBLANE = 8       # row tiles are multiples of the sublane count
TM_MAX = 512      # max rows per grid step
VMEM_BUDGET = 48 * 1024 * 1024   # stay safely under v7x's 64 MiB physical VMEM


def _round_up(v, m):
    return ((v + m - 1) // m) * m


def _is_two_core_tc():
    """True on generations with 2 TensorCores per chip (v7x), where splitting
    the 'parallel' grid axis actually buys parallelism."""
    try:
        kind = jax.devices()[0].device_kind.lower()
    except Exception:
        return False
    return ("v7" in kind) or ("7x" in kind)


def _choose_tm(n_rows, two_cores):
    if n_rows <= SUBLANE:
        return SUBLANE
    if two_cores:
        if n_rows >= 2 * TM_MAX:
            return TM_MAX
        # >= 2 grid steps so both TensorCores get work.
        return _round_up(pl.cdiv(n_rows, 2), SUBLANE)
    # v5e/v6e: the grid is a serial loop on one TC -> single step if it fits.
    if n_rows <= TM_MAX:
        return _round_up(n_rows, SUBLANE)
    return TM_MAX


def _vmem_footprint(tm, d_in, d_hid_p, d_out, out_bytes, use_scratch):
    f = 2 * tm * d_in * 4                         # x tile (f32), double-buffered
    f += 2 * tm * d_out * out_bytes               # out tile, double-buffered
    f += (d_in * d_hid_p + d_hid_p * d_out) * 2   # weights (bf16), single-buffered
    f += (d_hid_p + d_out) * 4                    # biases (f32)
    if use_scratch:
        f += tm * d_hid_p * 2                     # hidden staging buffer (bf16)
    return f


def _compose_kernel_reg(x_ref, w1t_ref, b1_ref, w2t_ref, b2_ref, o_ref):
    # Small row tiles: keep the hidden activation in vregs (no VMEM round-trip).
    h = jnp.dot(x_ref[...].astype(jnp.bfloat16), w1t_ref[...],
                preferred_element_type=jnp.float32)
    h = (h + b1_ref[...]).astype(jnp.bfloat16)
    z = jnp.dot(h, w2t_ref[...], preferred_element_type=jnp.float32)
    o_ref[...] = (z + b2_ref[...]).astype(o_ref.dtype)


def _compose_kernel_scratch(x_ref, w1t_ref, b1_ref, w2t_ref, b2_ref, o_ref, h_ref):
    # Large row tiles: stage the hidden activation in VMEM to bound vreg pressure.
    h = jnp.dot(x_ref[...].astype(jnp.bfloat16), w1t_ref[...],
                preferred_element_type=jnp.float32)
    h_ref[...] = (h + b1_ref[...]).astype(h_ref.dtype)
    z = jnp.dot(h_ref[...], w2t_ref[...], preferred_element_type=jnp.float32)
    o_ref[...] = (z + b2_ref[...]).astype(o_ref.dtype)


def prepare_compose_params(w1, b1, w2, b2):
    """One-time (outside the hot path) transpose / pad / bf16-cast of the
    PyTorch-convention Linear parameters (w: (out, in), b: (out,)).

    Only the hidden dim is zero-padded to the lane width; d_in / d_out keep
    their logical sizes so x and the output need no per-call pad or slice."""
    d_hid, d_in = w1.shape
    d_out = w2.shape[0]
    d_hid_p = _round_up(d_hid, LANE)

    w1t = jnp.zeros((d_in, d_hid_p), jnp.bfloat16).at[:, :d_hid].set(
        jnp.asarray(w1, jnp.float32).T.astype(jnp.bfloat16))
    w2t = jnp.zeros((d_hid_p, d_out), jnp.bfloat16).at[:d_hid, :].set(
        jnp.asarray(w2, jnp.float32).T.astype(jnp.bfloat16))
    b1r = jnp.zeros((1, d_hid_p), jnp.float32).at[0, :d_hid].set(
        jnp.asarray(b1, jnp.float32))
    b2r = jnp.asarray(b2, jnp.float32).reshape(1, d_out)
    return dict(w1t=w1t, b1=b1r, w2t=w2t, b2=b2r,
                d_in=d_in, d_hid=d_hid, d_out=d_out)


def _resident_spec(block_shape, index_map):
    """Constant-index resident operands: single-buffer to halve their VMEM cost."""
    try:
        return pl.BlockSpec(block_shape, index_map, pipeline_mode=pl.Buffered(1))
    except TypeError:  # older jax without pipeline_mode kwarg: default buffering
        return pl.BlockSpec(block_shape, index_map)


def compose_forward(x, params, out_dtype=jnp.float32):
    """Fused y = second(first(x)).  `out_dtype=jnp.bfloat16` halves the output
    HBM writeback if the downstream consumer tolerates it (the hidden is
    already rounded to bf16)."""
    N, d_in = x.shape
    assert d_in == params["d_in"]
    d_hid_p = params["w1t"].shape[1]
    d_out = params["d_out"]
    out_bytes = jnp.dtype(out_dtype).itemsize

    two_cores = _is_two_core_tc()
    tm = _choose_tm(N, two_cores)
    # Shrink tm if the per-step footprint would exceed the portable VMEM budget.
    while tm > SUBLANE and _vmem_footprint(
            tm, d_in, d_hid_p, d_out, out_bytes, tm > LANE) > VMEM_BUDGET:
        tm = max(SUBLANE, _round_up(tm // 2, SUBLANE))
    use_scratch = tm > LANE
    footprint = _vmem_footprint(tm, d_in, d_hid_p, d_out, out_bytes, use_scratch)
    # Explicit scoped-VMEM limit: >= 32 MiB (v5e defaults to 16), <= 64 MiB (v7x).
    vmem_limit = int(min(max(footprint + (8 << 20), 32 << 20), 64 << 20))

    grid = (pl.cdiv(N, tm),)
    n_exec = grid[0] * tm  # rows actually pushed through the MXU (ragged last block)

    cost = pl.CostEstimate(
        flops=2 * n_exec * (d_in * d_hid_p + d_hid_p * d_out),
        transcendentals=0,
        bytes_accessed=(N * d_in * 4
                        + (params["w1t"].size + params["w2t"].size) * 2
                        + (params["b1"].size + params["b2"].size) * 4
                        + N * d_out * out_bytes),
    )

    kernel = _compose_kernel_scratch if use_scratch else _compose_kernel_reg
    scratch_shapes = ([pltpu.VMEM((tm, d_hid_p), jnp.bfloat16)]
                      if use_scratch else [])

    return pl.pallas_call(
        kernel,
        out_shape=jax.ShapeDtypeStruct((N, d_out), out_dtype),
        grid_spec=pltpu.PrefetchScalarGridSpec(
            num_scalar_prefetch=0,
            grid=grid,
            in_specs=[
                pl.BlockSpec((tm, d_in), lambda i: (i, 0)),        # x row tile (streamed)
                _resident_spec((d_in, d_hid_p), lambda i: (0, 0)),  # W1^T (resident)
                _resident_spec((1, d_hid_p), lambda i: (0, 0)),     # b1
                _resident_spec((d_hid_p, d_out), lambda i: (0, 0)), # W2^T (resident)
                _resident_spec((1, d_out), lambda i: (0, 0)),       # b2
            ],
            out_specs=pl.BlockSpec((tm, d_out), lambda i: (i, 0)),
            scratch_shapes=scratch_shapes,
        ),
        compiler_params=pltpu.CompilerParams(
            dimension_semantics=("parallel",),
            vmem_limit_bytes=vmem_limit),
        cost_estimate=cost,
    )(x, params["w1t"], params["b1"], params["w2t"], params["b2"])


if __name__ == "__main__":
    # Small shapes consistent with an EGNN feed-forward Compose block.
    N, D_IN, D_HID, D_OUT = 16, 32, 64, 32

    key = jax.random.PRNGKey(0)
    kx, k1, k2, k3, k4 = jax.random.split(key, 5)

    x = jax.random.normal(kx, (N, D_IN), dtype=jnp.float32)

    # Deterministic synthetic parameters (PyTorch Linear shapes: (out, in)).
    bound1 = 1.0 / (D_IN ** 0.5)
    bound2 = 1.0 / (D_HID ** 0.5)
    w1 = jax.random.uniform(k1, (D_HID, D_IN), jnp.float32, -bound1, bound1)
    b1 = jax.random.uniform(k2, (D_HID,), jnp.float32, -bound1, bound1)
    w2 = jax.random.uniform(k3, (D_OUT, D_HID), jnp.float32, -bound2, bound2)
    b2 = jax.random.uniform(k4, (D_OUT,), jnp.float32, -bound2, bound2)

    params = prepare_compose_params(w1, b1, w2, b2)   # one-time prep
    out = compose_forward(x, params)
    out = jax.block_until_ready(out)
    assert out.shape == (N, D_OUT)

    # Reference matching the kernel's precision policy: bf16 inputs/weights,
    # f32 accumulation, hidden activation rounded to bf16 between the layers.
    xb = x.astype(jnp.bfloat16).astype(jnp.float32)
    w1b = w1.astype(jnp.bfloat16).astype(jnp.float32)
    w2b = w2.astype(jnp.bfloat16).astype(jnp.float32)
    h_ref = xb @ w1b.T + b1
    h_ref = h_ref.astype(jnp.bfloat16).astype(jnp.float32)
    ref = h_ref @ w2b.T + b2
    assert jnp.allclose(out, ref, atol=1e-2, rtol=1e-2), "mismatch vs reference"

    # Sanity vs the pure-f32 Compose semantics (loose, bf16 rounding error only).
    ref_f32 = (x @ w1.T + b1) @ w2.T + b2
    assert jnp.allclose(out, ref_f32, atol=5e-2, rtol=5e-2), "drifted from f32 semantics"

    print("KERNEL_OK")
</pallas_src>

<mosaic_0001>
module attributes {stable_mosaic.version = 11 : i64} {
  func.func @_compose_kernel_reg(%arg0: i32, %arg1: memref<16x32xf32, #tpu.memory_space<vmem>>, %arg2: memref<32x128xbf16, #tpu.memory_space<vmem>>, %arg3: memref<1x128xf32, #tpu.memory_space<vmem>>, %arg4: memref<128x32xbf16, #tpu.memory_space<vmem>>, %arg5: memref<1x32xf32, #tpu.memory_space<vmem>>, %arg6: memref<16x32xf32, #tpu.memory_space<vmem>>) attributes {dimension_semantics = [#tpu.dimension_semantics<parallel>], iteration_bounds = array<i64: 1>, scalar_prefetch = 0 : i64, scratch_operands = 0 : i64, tpu.core_type = #tpu.core_type<tc>, window_params = [{transform_indices = @transform_0, window_bounds = array<i64: 16, 32>}, {pipeline_mode = #tpu.pipeline_mode<synchronous>, transform_indices = @transform_1, window_bounds = array<i64: 32, 128>}, {pipeline_mode = #tpu.pipeline_mode<synchronous>, transform_indices = @transform_2, window_bounds = array<i64: 1, 128>}, {pipeline_mode = #tpu.pipeline_mode<synchronous>, transform_indices = @transform_3, window_bounds = array<i64: 128, 32>}, {pipeline_mode = #tpu.pipeline_mode<synchronous>, transform_indices = @transform_4, window_bounds = array<i64: 1, 32>}, {transform_indices = @transform_5, window_bounds = array<i64: 16, 32>}]} {
    %c0 = arith.constant 0 : index
    %c0_0 = arith.constant 0 : index
    %0 = vector.load %arg1[%c0, %c0_0] : memref<16x32xf32, #tpu.memory_space<vmem>>, vector<16x32xf32>
    %1 = arith.truncf %0 : vector<16x32xf32> to vector<16x32xbf16>
    %c0_1 = arith.constant 0 : index
    %c0_2 = arith.constant 0 : index
    %2 = vector.load %arg2[%c0_1, %c0_2] : memref<32x128xbf16, #tpu.memory_space<vmem>>, vector<32x128xbf16>
    %cst = arith.constant dense<0.000000e+00> : vector<16x128xf32>
    %3 = tpu.matmul %1, %2, %cst {dimension_numbers = #tpu.dot_dimension_numbers<[1], [0], [0], [1], [0, 0, 1, 1], [], []>} : vector<16x32xbf16>, vector<32x128xbf16>, vector<16x128xf32> -> vector<16x128xf32>
    %c0_3 = arith.constant 0 : index
    %c0_4 = arith.constant 0 : index
    %4 = vector.load %arg3[%c0_3, %c0_4] : memref<1x128xf32, #tpu.memory_space<vmem>>, vector<1x128xf32>
    %5 = vector.broadcast %4 : vector<1x128xf32> to vector<16x128xf32>
    %6 = arith.addf %3, %5 : vector<16x128xf32>
    %7 = arith.truncf %6 : vector<16x128xf32> to vector<16x128xbf16>
    %c0_5 = arith.constant 0 : index
    %c0_6 = arith.constant 0 : index
    %8 = vector.load %arg4[%c0_5, %c0_6] : memref<128x32xbf16, #tpu.memory_space<vmem>>, vector<128x32xbf16>
    %cst_7 = arith.constant dense<0.000000e+00> : vector<16x32xf32>
    %9 = tpu.matmul %7, %8, %cst_7 {dimension_numbers = #tpu.dot_dimension_numbers<[1], [0], [0], [1], [0, 0, 1, 1], [], []>} : vector<16x128xbf16>, vector<128x32xbf16>, vector<16x32xf32> -> vector<16x32xf32>
    %c0_8 = arith.constant 0 : index
    %c0_9 = arith.constant 0 : index
    %10 = vector.load %arg5[%c0_8, %c0_9] : memref<1x32xf32, #tpu.memory_space<vmem>>, vector<1x32xf32>
    %11 = vector.broadcast %10 : vector<1x32xf32> to vector<16x32xf32>
    %12 = arith.addf %9, %11 : vector<16x32xf32>
    %c0_10 = arith.constant 0 : index
    %c0_11 = arith.constant 0 : index
    %13 = vector.load %arg6[%c0_10, %c0_11] : memref<16x32xf32, #tpu.memory_space<vmem>>, vector<16x32xf32>
    tpu.vector_store %arg6[%c0_10, %c0_11], %12 {strides = array<i32>} : memref<16x32xf32, #tpu.memory_space<vmem>>, vector<16x32xf32>,
    return
  }
  func.func @transform_0(%arg0: i32) -> (i32, i32) {
    %c0_i32 = arith.constant 0 : i32
    %c0_i32_0 = arith.constant 0 : i32
    return %arg0, %c0_i32 : i32, i32
  }
  func.func @transform_1(%arg0: i32) -> (i32, i32) {
    %c0_i32 = arith.constant 0 : i32
    %c0_i32_0 = arith.constant 0 : i32
    %c0_i32_1 = arith.constant 0 : i32
    return %c0_i32, %c0_i32_0 : i32, i32
  }
  func.func @transform_2(%arg0: i32) -> (i32, i32) {
    %c0_i32 = arith.constant 0 : i32
    %c0_i32_0 = arith.constant 0 : i32
    %c0_i32_1 = arith.constant 0 : i32
    return %c0_i32, %c0_i32_0 : i32, i32
  }
  func.func @transform_3(%arg0: i32) -> (i32, i32) {
    %c0_i32 = arith.constant 0 : i32
    %c0_i32_0 = arith.constant 0 : i32
    %c0_i32_1 = arith.constant 0 : i32
    return %c0_i32, %c0_i32_0 : i32, i32
  }
  func.func @transform_4(%arg0: i32) -> (i32, i32) {
    %c0_i32 = arith.constant 0 : i32
    %c0_i32_0 = arith.constant 0 : i32
    %c0_i32_1 = arith.constant 0 : i32
    return %c0_i32, %c0_i32_0 : i32, i32
  }
  func.func @transform_5(%arg0: i32) -> (i32, i32) {
    %c0_i32 = arith.constant 0 : i32
    %c0_i32_0 = arith.constant 0 : i32
    return %arg0, %c0_i32 : i32, i32
  }
}

</mosaic_0001>

<bundles_post_ra>
// kernel: tpu_custom_call.1
= control target key start
LH: loop header
LB: loop body
LE: loop exit
PB: predicated region body
PF: predicated region fallthrough
CT: control target
= control target key end

     0   :  { %v316_v1 = vmov 0.0   ;;  %vm317_vm0 = vmmov 0   ;;  %vm48_vm1 = vcmask 261120   ;;  %s408_s0 = inlined_call_operand.vmem [shape: f32[16,32], index: 0, kind: input, shape index: {}]   ;;  %s409_s1 = inlined_call_operand.vmem [shape: bf16[32,128], index: 1, kind: input, shape index: {}]   ;;  %s410_s2 = inlined_call_operand.vmem [shape: f32[1,128], index: 2, kind: input, shape index: {}]   ;;  %s411_s3 = inlined_call_operand.vmem [shape: bf16[128,32], index: 3, kind: input, shape index: {}]   ;;  %s412_s4 = inlined_call_operand.vmem [shape: f32[1,32], index: 4, kind: input, shape index: {}]   ;;  %s413_s5 = inlined_call_operand.hbm [shape: f32[16,32], index: 5, kind: output, shape index: {}]  }
   0x1   :  { %v282_v0 = vld [vmem:[%s409_s1] sm:$0xff]   ;;  %249 = vmatprep.subr.bf16.mxu0 %v316_v1  ;;  %v283_v2 = vld [vmem:[%s409_s1 + $0x8] sm:$0xff]   ;;  %257 = vmatprep.subr.bf16.mxu1 %v316_v1  ;;  %v286_v8 = vld [vmem:[%s411_s3 + $0x10] sm:$0xff]  }
   0x2   :  { %250 = vmatpush3.bf16.msra.mxu0 %v282_v0  ;;  %253 = vmatprep.mubr.msk.bf16.mxu0 %vm317_vm0, %v316_v1  ;;  %v22_v3 = vld [vmem:[%s408_s0] sm:$0xff]  ;;  %v23_v4 = vld [vmem:[%s408_s0 + $0x8] sm:$0xff] }
   0x3   :  { %251 = vmatprep.subr.bf16.mxu0 %v316_v1  ;;  %v284_v5 = vld [vmem:[%s411_s3] sm:$0xff]   ;;  %273 = vmatprep.mubr.msk.bf16.mxu1 %vm317_vm0, %v316_v1  ;;  %v24_v6 = vpack.c.bf16 %v23_v4, %v22_v3  ;;  %v285_v7 = vld [vmem:[%s411_s3 + $0x8] sm:$0xff]  }
   0x4   :  { %258 = vmatpush3.bf16.msra.mxu1 %v284_v5 }
   0x5   :  { %259 = vmatprep.subr.bf16.mxu1 %v316_v1 }
   0x6   :  { %252 = vmatpush3.bf16.msra.mxu0 %v283_v2 }
   0x8   :  { %260 = vmatpush3.bf16.msra.mxu1 %v285_v7 }
   0x9   :  { %254 = vmatmul.mubr.msk.bf16.vlgmr.msra.gmra.mrb[0].mxu0 %vm48_vm1, %v24_v6  ;;  %261 = vmatprep.subr.bf16.mxu1 %v316_v1 }
   0xa   :  { %10 = vsyncpa [#allocation3], 0  ;;  %v287_v9 = vld [vmem:[%s411_s3 + $0x18] sm:$0xff]   ;;  %v288_v10 = vld [vmem:[%s411_s3 + $0x20] sm:$0xff]   ;;  %s318_s19 = smov [#allocation2]  }
   0xb   :  { %v289_v11 = vld [vmem:[%s411_s3 + $0x28] sm:$0xff]   ;;  %v290_v12 = vld [vmem:[%s411_s3 + $0x30] sm:$0xff]   ;;  %v291_v13 = vld [vmem:[%s411_s3 + $0x38] sm:$0xff]   ;;  %s213_s20 = sshll.u32 %s318_s19, 4  ;;  %s214_s20 = int_to_ptr.vmem [resolvable:$true] %s213_s20 }
   0xc   :  { %262 = vmatpush3.bf16.msra.mxu1 %v286_v8  ;;  %v224_v14 = vld [vmem:[%s410_s2] ss:$0 sm:$0xff]  ;;  %s292_s2 = scalar_lea.vmem %s214_s20, 256  ;;  %p297_p1 = scmp.lt.s32.totalorder %s214_s20, %s214_s20 }
   0xd   :  { %263 = vmatprep.subr.bf16.mxu1 %v316_v1  ;;  %v228_v22 = vld [vmem:[%s412_s4] ss:$0 sm:$0xff]  ;;  %p293_p0 = scmp.ne.s32.totalorder %s214_s20, %s292_s2  ;;  %p298_p2 = scmp.lt.s32.totalorder %s292_s2, %s292_s2 }
   0xf   :  { %p299_p3 = por %p298_p2, %p297_p1 }
  0x10   :  { %264 = vmatpush3.bf16.msra.mxu1 %v287_v9 }
  0x11   :  { %265 = vmatprep.subr.bf16.mxu1 %v316_v1  ;;  %p300_p4 = pnand %p299_p3, %p293_p0 }
  0x14   :  { %266 = vmatpush3.bf16.msra.mxu1 %v288_v10 }
  0x15   :  { %267 = vmatprep.subr.bf16.mxu1 %v316_v1 }
  0x18   :  { %268 = vmatpush3.bf16.msra.mxu1 %v289_v11 }
  0x19   :  { %269 = vmatprep.subr.bf16.mxu1 %v316_v1 }
  0x1c   :  { %270 = vmatpush3.bf16.msra.mxu1 %v290_v12 }
  0x1d   :  { %271 = vmatprep.subr.bf16.mxu1 %v316_v1 }
  0x20   :  { %272 = vmatpush3.bf16.msra.mxu1 %v291_v13 }
  0xdc   :  { %v86_v15 = vpop.f32.mrb[0].mxu0 }
  0xdd   :  { %v255_v16 = vpop.f32.mrb[1].mxu0  ;;  %v87_v18 = vadd.f32 %v224_v14, %v86_v15 }
  0xde   :  { %v89_v17 = vpop.f32.mrb[2].mxu0 }
  0xdf   :  { %v90_v19 = vadd.f32 %v224_v14, %v89_v17  ;;  %v256_v20 = vpop.f32.mrb[3].mxu0 }
  0xe1   :  { %v93_v21 = vpack.c.bf16 %v90_v19, %v87_v18 }
  0xe3   :  { %274 = vmatmul.mubr.bf16.vlgmr.msra.gmra.mrb[0].mxu1 %v93_v21 }
 0x1b6   :  { %v199_v23 = vpop.f32.mrb[0].mxu1 }
 0x1b7   :  { %v200_v24 = vadd.f32 %v228_v22, %v199_v23  ;;  %v275_v25 = vpop.f32.mrb[1].mxu1 }
 0x1b8   :  { %v202_v26 = vpop.f32.mrb[2].mxu1 }
 0x1b9   :  { %206 = vst.msk [vmem:[#allocation2] sm:$0xff] %vm48_vm1, %v200_v24  ;;  %v203_v27 = vadd.f32 %v228_v22, %v202_v26  ;;  %v276_v28 = vpop.f32.mrb[3].mxu1 }
 0x1bb   :  { %207 = vst.msk [vmem:[#allocation2 + $0x8] sm:$0xff] %vm48_vm1, %v203_v27 }
 0x1bc   :  { %303 = shalt.err (!%p300_p4)
}
 0x1bd   :  { %s304_s21 = scalar_lea.hbm %s413_s5, 256 }
 0x1be   :  { %p305_p5 = scmp.ne.s32.totalorder %s413_s5, %s304_s21  ;;  %p308_p6 = scmp.lt.u32.totalorder %s304_s21, %s413_s5 }
 0x1c0   :  { %p310_p7 = pnand %p308_p6, %p305_p5 }
 0x1c2   :  { %313 = shalt.err (!%p310_p7)
}
 0x1c3   :  { %s319_s26 = smov 128   ;;  %s320_s27 = smov 8  }
 0x1c4   :  { %219 = dma.vmem_to_hbm [thread:$0]  %s214_s20, 256, %s413_s5, [#allocation3], %s319_s26, %s319_s26, %s320_s27  }
 0x1c5   :  { %314 = dma.done.wait [#allocation3], 256  }
 0x1c6   :  { %315 = vsyncadd [#allocation3], 4294967040 }
 0x1c7   :  { %223 = vsyncpa [#allocation3], 1 }

</bundles_post_ra>
